<compile_context>
chip_gen: v6e
topology: v6e:2x2x1
jax: 0.10.0
libtpu: 0.0.40
codegen_flags: <defaults>
</compile_context>

<pallas_src>
import jax
import jax.numpy as jnp
from jax.experimental import pallas as pl
from jax.experimental.pallas import tpu as pltpu

# Number of padding columns appended to [x|h] (first one is the bias column of
# ones; the rest hit zero weight rows).  16 keeps the bf16 contracting dim of
# the weight tile-aligned (sublane-pack granularity for bf16 is 16).
_BIAS_PAD = 16


def _lstm_step_kernel(hc_ref, x_ref, w_ref, hc_out_ref):
    """hc_ref: (B, 2H) f32 packed [h | c]; x_ref: (B, In) f32 (or bf16);
    w_ref: (In+H+_BIAS_PAD, 4H) bf16, gate cols [i,f,o,g], row In+H = bias,
    remaining rows zero; hc_out_ref aliases hc_ref's HBM buffer."""
    H = hc_ref.shape[-1] // 2
    B = hc_ref.shape[0]

    x = x_ref[...]
    h = hc_ref[:, :H]                         # (B, H) f32
    c = hc_ref[:, H:]                         # (B, H) f32

    # Fused gate matmul with bias folded in: [x | h | 1...] @ W_aug,
    # bf16 MXU operands, f32 accumulation.  (Reads of h/c complete before the
    # aliased output stores below, so in-place aliasing is safe.)
    ones_blk = jnp.ones((B, _BIAS_PAD), jnp.bfloat16)
    xh1 = jnp.concatenate(
        [x.astype(jnp.bfloat16), h.astype(jnp.bfloat16), ones_blk], axis=-1)
    gates = jnp.dot(xh1, w_ref[...],
                    preferred_element_type=jnp.float32)          # (B, 4H) f32

    # Gate columns were permuted at init to [i, f, o, g]:
    # one contiguous sigmoid over 3H lanes, one tanh over the trailing H lanes.
    sig = jax.nn.sigmoid(gates[:, :3 * H])
    i_g = sig[:, 0 * H:1 * H]
    f_g = sig[:, 1 * H:2 * H]
    o_g = sig[:, 2 * H:3 * H]
    g_g = jnp.tanh(gates[:, 3 * H:])

    c_new = f_g * c + i_g * g_g
    h_new = o_g * jnp.tanh(c_new)

    # Direct slice stores (no concat/lane-shift before the store).
    hc_out_ref[:, :H] = h_new
    hc_out_ref[:, H:] = c_new


def _lstm_step_pallas(hc, x, w_aug):
    """hc: (B, 2H) f32 packed [h | c]; x: (B, In); w_aug: (In+H+16, 4H) bf16."""
    B, twoH = hc.shape
    vmem = pl.BlockSpec(memory_space=pltpu.MemorySpace.VMEM)
    return pl.pallas_call(
        _lstm_step_kernel,
        out_shape=jax.ShapeDtypeStruct((B, twoH), jnp.float32),
        in_specs=[vmem, vmem, vmem],
        out_specs=vmem,
        input_output_aliases={0: 0},   # output reuses the packed-state buffer
    )(hc, x, w_aug)


# Fast recurrent path: packed state carried across calls; donation + the
# pallas-level alias let XLA update the HBM state buffer in place.
_step_packed = jax.jit(_lstm_step_pallas, donate_argnums=(0,))


@jax.jit
def _forward_compat(x, h_prev, c_prev, w_aug):
    """PyTorch-compatible API: x (B,In); h_prev/c_prev (B,1,H).
    Pack/unpack happens only here, inside one jit (XLA temps, no extra
    cross-call HBM round trips)."""
    hc = jnp.concatenate([h_prev[:, 0, :], c_prev[:, 0, :]], axis=-1)
    hc_new = _lstm_step_pallas(hc, x, w_aug)
    H = hc_new.shape[-1] // 2
    h_new = hc_new[:, :H]
    c_new = hc_new[:, H:]
    return h_new, h_new[:, None, :], c_new[:, None, :]


class LSTMWrapperOneStep:
    """JAX/Pallas re-implementation of the PyTorch module's forward pass."""

    def __init__(self, in_size, out_size, key):
        self.in_size = in_size
        self.out_size = out_size
        H = out_size
        k = float(H) ** -0.5
        k1, k2, k3, k4 = jax.random.split(key, 4)
        # PyTorch nn.LSTM params: weight_ih_l0 (4H, In), weight_hh_l0 (4H, H),
        # bias_ih_l0 (4H,), bias_hh_l0 (4H,), init U(-1/sqrt(H), 1/sqrt(H)),
        # gate row order [i, f, g, o].
        w_ih = jax.random.uniform(k1, (4 * H, in_size), jnp.float32, -k, k)
        w_hh = jax.random.uniform(k2, (4 * H, H), jnp.float32, -k, k)
        b_ih = jax.random.uniform(k3, (4 * H,), jnp.float32, -k, k)
        b_hh = jax.random.uniform(k4, (4 * H,), jnp.float32, -k, k)

        # Fuse the two weights: [x|h] @ [W_ih | W_hh]^T == x@W_ih^T + h@W_hh^T.
        # Permute gate columns [i, f, g, o] -> [i, f, o, g] so sigmoid covers
        # one contiguous 3H block.
        perm = jnp.concatenate([
            jnp.arange(0, H), jnp.arange(H, 2 * H),
            jnp.arange(3 * H, 4 * H), jnp.arange(2 * H, 3 * H)])
        w_cat_f32 = jnp.concatenate([w_ih, w_hh], axis=1).T[:, perm]  # (In+H,4H)
        bias_f32 = (b_ih + b_hh)[perm]                                # (4H,)

        # Augment: row In+H = bias, remaining (_BIAS_PAD-1) rows zero.
        w_aug_f32 = jnp.concatenate(
            [w_cat_f32, bias_f32[None, :],
             jnp.zeros((_BIAS_PAD - 1, 4 * H), jnp.float32)], axis=0)
        self.w_aug = w_aug_f32.astype(jnp.bfloat16)    # (In+H+16, 4H) bf16

        # f32 copies kept for reference checks only.
        self.w_cat_f32 = w_cat_f32
        self.bias_f32 = bias_f32

    # --- PyTorch-compatible (tuple of (B,1,H)) API ---------------------------
    def get_initial_state(self, batch_size):
        h = jnp.zeros((batch_size, 1, self.out_size), jnp.float32)
        return (h, h)

    def forward(self, x, h_state):
        out, h_new, c_new = _forward_compat(
            x, h_state[0], h_state[1], self.w_aug)
        return out, (h_new, c_new)

    # --- fast packed-state API (state carried across steps in place) --------
    def get_initial_state_packed(self, batch_size):
        return jnp.zeros((batch_size, 2 * self.out_size), jnp.float32)

    def pack_state(self, h, c):
        return jnp.concatenate([h[:, 0, :], c[:, 0, :]], axis=-1)

    def unpack_state(self, hc):
        H = self.out_size
        return hc[:, None, :H], hc[:, None, H:]

    def output_from_state(self, hc):
        return hc[:, :self.out_size]

    def step_packed(self, x, hc):
        """hc is consumed (donated); returns the new packed state."""
        return _step_packed(hc, x, self.w_aug)


def _reference_step(x, h, c, w, b):
    """Pure-JAX reference, gate column order [i, f, o, g] (same math as the
    PyTorch [i, f, g, o] LSTM cell, columns consistently permuted).
    w: (In+H, 4H) (f32 or bf16); b: (4H,)."""
    H = h.shape[-1]
    xh = jnp.concatenate([x, h], axis=-1).astype(w.dtype)
    gates = (jnp.dot(xh, w, preferred_element_type=jnp.float32)
             + b[None, :].astype(jnp.float32))
    i_g = jax.nn.sigmoid(gates[:, 0 * H:1 * H])
    f_g = jax.nn.sigmoid(gates[:, 1 * H:2 * H])
    o_g = jax.nn.sigmoid(gates[:, 2 * H:3 * H])
    g_g = jnp.tanh(gates[:, 3 * H:])
    c_new = f_g * c + i_g * g_g
    h_new = o_g * jnp.tanh(c_new)
    return h_new, c_new


if __name__ == "__main__":
    batch, in_size, hidden, T = 2, 32, 32, 8

    key = jax.random.PRNGKey(0)
    k_params, k_x, k_h, k_c, k_seq = jax.random.split(key, 5)

    model = LSTMWrapperOneStep(in_size, hidden, k_params)

    x = jax.random.normal(k_x, (batch, in_size), jnp.float32)
    # Non-zero state to exercise the recurrent path.
    h0 = jax.random.normal(k_h, (batch, 1, hidden), jnp.float32) * 0.1
    c0 = jax.random.normal(k_c, (batch, 1, hidden), jnp.float32) * 0.1

    # bf16 (kernel-equivalent) and f32 (PyTorch-equivalent) reference weights.
    w_bf = model.w_aug[:in_size + hidden]                     # (In+H, 4H) bf16
    b_bf = model.w_aug[in_size + hidden].astype(jnp.float32)  # bias row as f32

    # --- 1) single step via the PyTorch-compatible API -----------------------
    out, (h1, c1) = model.forward(x, (h0, c0))
    jax.block_until_ready((out, h1, c1))
    assert out.shape == (batch, hidden)
    assert h1.shape == (batch, 1, hidden) and c1.shape == (batch, 1, hidden)

    ref_h_bf, ref_c_bf = _reference_step(x, h0[:, 0, :], c0[:, 0, :], w_bf, b_bf)
    assert jnp.allclose(out, ref_h_bf, atol=1e-3, rtol=1e-3)
    assert jnp.allclose(h1[:, 0, :], ref_h_bf, atol=1e-3, rtol=1e-3)
    assert jnp.allclose(c1[:, 0, :], ref_c_bf, atol=1e-3, rtol=1e-3)

    ref_h_f32, ref_c_f32 = _reference_step(
        x, h0[:, 0, :], c0[:, 0, :], model.w_cat_f32, model.bias_f32)
    assert jnp.allclose(out, ref_h_f32, atol=3e-2)
    assert jnp.allclose(c1[:, 0, :], ref_c_f32, atol=3e-2)

    # --- 2) multi-step fast path: packed state carried/donated across steps --
    xs = jax.random.normal(k_seq, (T, batch, in_size), jnp.float32)
    hc = model.pack_state(h0, c0)                              # (B, 2H)
    for t in range(T):
        hc = model.step_packed(xs[t], hc)   # hc donated; HBM buffer reused
    jax.block_until_ready(hc)
    assert hc.shape == (batch, 2 * hidden)

    rh, rc = h0[:, 0, :], c0[:, 0, :]
    rh32, rc32 = h0[:, 0, :], c0[:, 0, :]
    for t in range(T):
        rh, rc = _reference_step(xs[t], rh, rc, w_bf, b_bf)
        rh32, rc32 = _reference_step(xs[t], rh32, rc32,
                                     model.w_cat_f32, model.bias_f32)

    h_final = hc[:, :hidden]
    c_final = hc[:, hidden:]
    assert jnp.allclose(h_final, rh, atol=2e-3, rtol=2e-3)
    assert jnp.allclose(c_final, rc, atol=2e-3, rtol=2e-3)
    assert jnp.allclose(h_final, rh32, atol=3e-2)
    assert jnp.allclose(c_final, rc32, atol=3e-2)

    print("KERNEL_OK")
</pallas_src>

<mosaic_0001>
module attributes {stable_mosaic.version = 11 : i64} {
  func.func @_lstm_step_kernel(%arg0: memref<2x64xf32, #tpu.memory_space<vmem>>, %arg1: memref<2x32xf32, #tpu.memory_space<vmem>>, %arg2: memref<80x128xbf16, #tpu.memory_space<vmem>>, %arg3: memref<2x64xf32, #tpu.memory_space<vmem>>) attributes {dimension_semantics = [], scalar_prefetch = 0 : i64, scratch_operands = 0 : i64, tpu.core_type = #tpu.core_type<tc>} {
    %c0 = arith.constant 0 : index
    %c0_0 = arith.constant 0 : index
    %0 = vector.load %arg1[%c0, %c0_0] : memref<2x32xf32, #tpu.memory_space<vmem>>, vector<2x32xf32>
    %c0_1 = arith.constant 0 : index
    %c0_2 = arith.constant 0 : index
    %1 = vector.load %arg0[%c0_1, %c0_2] : memref<2x64xf32, #tpu.memory_space<vmem>>, vector<2x32xf32>
    %c0_3 = arith.constant 0 : index
    %c32 = arith.constant 32 : index
    %2 = vector.load %arg0[%c0_3, %c32] : memref<2x64xf32, #tpu.memory_space<vmem>>, vector<2x32xf32>
    %cst = arith.constant 1.000000e+00 : bf16
    %3 = vector.broadcast %cst : bf16 to vector<2x16xbf16>
    %4 = arith.truncf %0 : vector<2x32xf32> to vector<2x32xbf16>
    %5 = arith.truncf %1 : vector<2x32xf32> to vector<2x32xbf16>
    %6 = tpu.concatenate %4, %5, %3 in 1 : vector<2x32xbf16>, vector<2x32xbf16>, vector<2x16xbf16> -> vector<2x80xbf16>
    %c0_4 = arith.constant 0 : index
    %c0_5 = arith.constant 0 : index
    %7 = vector.load %arg2[%c0_4, %c0_5] : memref<80x128xbf16, #tpu.memory_space<vmem>>, vector<80x128xbf16>
    %cst_6 = arith.constant dense<0.000000e+00> : vector<2x128xf32>
    %8 = tpu.matmul %6, %7, %cst_6 {dimension_numbers = #tpu.dot_dimension_numbers<[1], [0], [0], [1], [0, 0, 1, 1], [], []>} : vector<2x80xbf16>, vector<80x128xbf16>, vector<2x128xf32> -> vector<2x128xf32>
    %9 = vector.extract_strided_slice %8 {offsets = [0, 0], sizes = [2, 96], strides = [1, 1]} : vector<2x128xf32> to vector<2x96xf32>
    %10 = arith.negf %9 : vector<2x96xf32>
    %11 = math.exp %10 : vector<2x96xf32>
    %cst_7 = arith.constant 1.000000e+00 : f32
    %12 = vector.broadcast %cst_7 : f32 to vector<2x96xf32>
    %13 = arith.addf %12, %11 : vector<2x96xf32>
    %14 = arith.divf %12, %13 : vector<2x96xf32>
    %15 = vector.extract_strided_slice %14 {offsets = [0, 0], sizes = [2, 32], strides = [1, 1]} : vector<2x96xf32> to vector<2x32xf32>
    %16 = vector.extract_strided_slice %14 {offsets = [0, 32], sizes = [2, 32], strides = [1, 1]} : vector<2x96xf32> to vector<2x32xf32>
    %17 = vector.extract_strided_slice %14 {offsets = [0, 64], sizes = [2, 32], strides = [1, 1]} : vector<2x96xf32> to vector<2x32xf32>
    %18 = vector.extract_strided_slice %8 {offsets = [0, 96], sizes = [2, 32], strides = [1, 1]} : vector<2x128xf32> to vector<2x32xf32>
    %19 = math.tanh %18 : vector<2x32xf32>
    %20 = arith.mulf %16, %2 : vector<2x32xf32>
    %21 = arith.mulf %15, %19 : vector<2x32xf32>
    %22 = arith.addf %20, %21 : vector<2x32xf32>
    %23 = math.tanh %22 : vector<2x32xf32>
    %24 = arith.mulf %17, %23 : vector<2x32xf32>
    %c0_8 = arith.constant 0 : index
    %c0_9 = arith.constant 0 : index
    %25 = vector.load %arg3[%c0_8, %c0_9] : memref<2x64xf32, #tpu.memory_space<vmem>>, vector<2x32xf32>
    tpu.vector_store %arg3[%c0_8, %c0_9], %24 {strides = array<i32>} : memref<2x64xf32, #tpu.memory_space<vmem>>, vector<2x32xf32>,
    %c0_10 = arith.constant 0 : index
    %c32_11 = arith.constant 32 : index
    %26 = vector.load %arg3[%c0_10, %c32_11] : memref<2x64xf32, #tpu.memory_space<vmem>>, vector<2x32xf32>
    tpu.vector_store %arg3[%c0_10, %c32_11], %22 {strides = array<i32>} : memref<2x64xf32, #tpu.memory_space<vmem>>, vector<2x32xf32>,
    return
  }
}

</mosaic_0001>

<bundles_post_ra>
// kernel: _forward_compat.1
= control target key start
LH: loop header
LB: loop body
LE: loop exit
PB: predicated region body
PF: predicated region fallthrough
CT: control target
= control target key end

     0   :  { %8 = vsyncpa [#allocation3], 0  ;;  %s232_s12 = smov [#allocation2]   ;;  %s280_s0 = inlined_call_operand.vmem [shape: f32[2,64], index: 0, kind: input, shape index: {}, may-alias: {0,3}]   ;;  %s281_s1 = inlined_call_operand.vmem [shape: f32[2,32], index: 1, kind: input, shape index: {}]   ;;  %s282_s2 = inlined_call_operand.hbm [shape: bf16[80,128], index: 2, kind: input, shape index: {}]   ;;  %s283_s3 = inlined_call_operand.vmem [shape: f32[2,64], index: 3, kind: output, shape index: {}, may-alias: {0,3}]  }
   0x1   :  { %s18_s13 = sshll.u32 %s232_s12, 4  ;;  %s19_s13 = int_to_ptr.vmem [resolvable:$true] %s18_s13 }
   0x2   :  { %s218_s14 = scalar_lea.vmem %s19_s13, 640  ;;  %p223_p1 = scmp.lt.s32.totalorder %s19_s13, %s19_s13 }
   0x3   :  { %p219_p0 = scmp.ne.s32.totalorder %s19_s13, %s218_s14  ;;  %p224_p2 = scmp.lt.s32.totalorder %s218_s14, %s218_s14 }
   0x5   :  { %p225_p3 = por %p224_p2, %p223_p1 }
   0x7   :  { %p226_p4 = pnand %p225_p3, %p219_p0 }
   0x9   :  { %229 = shalt.err (!%p226_p4)
}
   0xa   :  { %s233_s15 = smov 64   ;;  %s234_s16 = smov 4  }
   0xb   :  { %24 = dma.hbm_to_vmem [thread:$0]  %s282_s2, 640, %s19_s13, [#allocation3], %s233_s15, %s233_s15, %s234_s16  }
   0xc   :  { %230 = dma.done.wait [#allocation3], 640  }
   0xd   :  { %231 = vsyncadd [#allocation3], 4294966656  ;;  %v235_v0 = vmov 0.0   ;;  %vm236_vm0 = vmmov 0   ;;  %v31_v1 = vld [vmem:[%s280_s0] sm:$0x3] }
   0xe   :  { %177 = vmatprep.subr.bf16.mxu0 %v235_v0  ;;  %187 = vmatprep.mubr.msk.bf16.mxu0 %vm236_vm0, %v235_v0  ;;  %v33_v2 = vpack.c.bf16 %v31_v1, %v31_v1  ;;  %v197_v3 = vld [vmem:[#allocation2 + $0x20] sm:$0xff]   ;;  %s237_s21 = smov 32   ;;  %v198_v4 = vld [vmem:[#allocation2 + $0x18] sm:$0xff]   ;;  %v199_v5 = vld [vmem:[#allocation2 + $0x10] sm:$0xff]   ;;  %vm37_vm1 = vcmask 261120   ;;  %vm41_vm2 = vcmask 523264  }
   0xf   :  { %178 = vmatpush3.bf16.msra.mxu0 %v197_v3  ;;  %v200_v6 = vld [vmem:[#allocation2 + $0x8] sm:$0xff]   ;;  %v201_v7 = vld [vmem:[#allocation2] sm:$0xff]   ;;  %vm84_vm3 = vcmask 654336   ;;  %vm155_vm4 = vcmask 254976   ;;  %vm157_vm5 = vcmask 517376  }
  0x10   :  { %35 = vrot.lane.b32.xlu0 %v33_v2, %s237_s21  ;;  %179 = vmatprep.subr.bf16.mxu0 %v235_v0  ;;  %v30_v8 = vld [vmem:[%s281_s1] sm:$0x3] }
  0x11   :  { %v32_v9 = vpack.c.bf16 %v30_v8, %v30_v8 }
  0x13   :  { %180 = vmatpush3.bf16.msra.mxu0 %v198_v4 }
  0x14   :  { %181 = vmatprep.subr.bf16.mxu0 %v235_v0 }
  0x17   :  { %182 = vmatpush3.bf16.msra.mxu0 %v199_v5 }
  0x18   :  { %183 = vmatprep.subr.bf16.mxu0 %v235_v0 }
  0x1b   :  { %184 = vmatpush3.bf16.msra.mxu0 %v200_v6 }
  0x1c   :  { %185 = vmatprep.subr.bf16.mxu0 %v235_v0 }
  0x1f   :  { %186 = vmatpush3.bf16.msra.mxu0 %v201_v7 }
  0x82   :  { %v36_v10 = vpop.permute.xlu0 %35 }
  0x83   :  { %v40_v11 = vsel %vm37_vm1, %v32_v9, %v36_v10 }
  0x84   :  { %v43_v12 = vsel %vm41_vm2, %v40_v11, 1065369472 }
  0x85   :  { %188 = vmatmul.mubr.msk.bf16.vlgmr.msra.gmra.mxu0 %vm84_vm3, %v43_v12 }
 0x145   :  { %v121_v13 = vpop.f32.mrf.mxu0 }
 0x146   :  { %202 = vtanh.f32 %v121_v13  ;;  %v170_v18 = vmul.f32 -1.442695, %v121_v13 }
 0x147   :  { %v189_v14 = vpop.f32.mrf.mxu0 }
 0x148   :  { %204 = vpow2.f32 %v170_v18 }
 0x149   :  { %v124_v15 = vpop.f32.mrf.mxu0 }
 0x14b   :  { %v190_v16 = vpop.f32.mrf.mxu0 }
 0x153   :  { %v203_v17 = vpop.eup %202 }
 0x154   :  { %136 = vrot.lane.b32.xlu0 %v203_v17, %s237_s21 }
 0x155   :  { %v205_v19 = vpop.eup %204 }
 0x156   :  { %v130_v20 = vadd.f32 1.0, %v205_v19 }
 0x158   :  { %206 = vrcp.f32 %v130_v20 }
 0x165   :  { %v207_v21 = vpop.eup %206 }
 0x166   :  { %v134_v24 = vmul.f32 %v207_v21, %v31_v1 }
 0x1c6   :  { %v137_v22 = vpop.permute.xlu0 %136 }
 0x1c7   :  { %v139_v23 = vmul.f32 %v207_v21, %v137_v22 }
 0x1c9   :  { %141 = vrot.lane.b32.xlu1 %v139_v23, %s237_s21 }
 0x23b   :  { %v142_v25 = vpop.permute.xlu1 %141 }
 0x23c   :  { %v144_v26 = vadd.f32 %v142_v25, %v134_v24 }
 0x23e   :  { %208 = vtanh.f32 %v144_v26 }
 0x24b   :  { %v209_v27 = vpop.eup %208 }
 0x24c   :  { %147 = vrot.lane.b32.xlu1 %v209_v27, %s237_s21 }
 0x2be   :  { %v148_v28 = vpop.permute.xlu1 %147 }
 0x2bf   :  { %v150_v29 = vmul.f32 %v207_v21, %v148_v28 }
 0x2c1   :  { %152 = vrot.lane.b32.xlu0 %v150_v29, %s233_s15 }
 0x333   :  { %v153_v30 = vpop.permute.xlu0 %152 }
 0x334   :  { %156 = vst.msk [vmem:[%s283_s3] sm:$0x3] %vm155_vm4, %v153_v30 }
 0x335   :  { %158 = vst.msk [vmem:[%s283_s3] sm:$0x3] %vm157_vm5, %v144_v26 }
 0x336   :  { %163 = vsyncpa [#allocation3], 1 }

</bundles_post_ra>
